<compile_context>
chip_gen: v5e
topology: v5e:2x2
jax: 0.10.0
libtpu: 0.0.40
codegen_flags: <defaults>
</compile_context>

<pallas_src>
import jax
import jax.numpy as jnp
from jax.experimental import pallas as pl
from jax.experimental.pallas import tpu as pltpu


def _make_dma_view_kernel(row_splits, rows):
    """Kernel factory: HBM->HBM copy of (rows, o) via static row-chunk DMAs.

    row_splits: static tuple of (start, stop) Python ints along axis 0.
    """

    def kernel(x_ref, o_ref, sems):
        copies = []
        for idx, (r0, r1) in enumerate(row_splits):
            if r0 == 0 and r1 == rows:
                # Whole-array copy: no slicing needed.
                src, dst = x_ref, o_ref
            else:
                size = r1 - r0
                src = x_ref.at[pl.ds(r0, size)]
                dst = o_ref.at[pl.ds(r0, size)]
            cp = pltpu.make_async_copy(src, dst, sems.at[idx])
            cp.start()
            copies.append(cp)
        # Wait after all starts so the DMA streams overlap.
        for cp in copies:
            cp.wait()

    return kernel


def view_forward(
    x: jax.Array,
    o: int,
    *,
    max_dma_streams: int = 4,
    min_bytes_per_dma: int = 512 << 10,
) -> jax.Array:
    """Equivalent of torch: x.view(-1, o), materialized via Pallas HBM->HBM DMA."""
    total = x.size
    if o <= 0 or total % o != 0:
        raise ValueError(f"cannot view size {total} as (-1, {o})")
    rows = total // o

    # Metadata-only reshape; all real data movement happens in the kernel DMAs.
    x2d = x.reshape(rows, o)

    dtype_bytes = jnp.dtype(x.dtype).itemsize
    total_bytes = total * dtype_bytes

    # Static near-equal split of the row axis into up to max_dma_streams DMAs.
    # Only split when each chunk stays above min_bytes_per_dma (tiny copies
    # gain nothing from multiple streams).
    n_dmas = max(1, min(max_dma_streams, rows, total_bytes // max(1, min_bytes_per_dma)))
    base, rem = divmod(rows, n_dmas)
    splits = []
    start = 0
    for i in range(n_dmas):
        size = base + (1 if i < rem else 0)
        splits.append((start, start + size))
        start += size
    assert start == rows

    kernel = _make_dma_view_kernel(tuple(splits), rows)

    return pl.pallas_call(
        kernel,
        out_shape=jax.ShapeDtypeStruct((rows, o), x.dtype),
        in_specs=[pl.BlockSpec(memory_space=pl.ANY)],   # stay in HBM, no auto-DMA
        out_specs=pl.BlockSpec(memory_space=pl.ANY),    # stay in HBM, no auto-DMA
        scratch_shapes=[pltpu.SemaphoreType.DMA((n_dmas,))],
        cost_estimate=pl.CostEstimate(
            flops=0, transcendentals=0, bytes_accessed=2 * total_bytes
        ),
    )(x2d)


if __name__ == "__main__":
    # Shapes consistent with AllCNN usage: NCHW feature map flattened before a
    # classifier head, o = C*H*W.
    N, C, H, W = 2, 4, 16, 16
    o = C * H * W  # 1024 (lane-aligned, single-DMA path)

    key = jax.random.PRNGKey(0)
    x = jax.random.normal(key, (N, C, H, W), dtype=jnp.float32)

    out = jax.block_until_ready(view_forward(x, o))
    ref = x.reshape(-1, o)
    assert out.shape == (N, o), out.shape
    assert out.dtype == x.dtype
    assert jnp.array_equal(out, ref), "Pallas View output mismatch (o=1024)"

    # Non-128-aligned o that *divides* the total size (2048): o=32 -> (64, 32).
    # Force the multi-stream DMA path with a tiny per-DMA byte threshold.
    o2 = 32
    out2 = jax.block_until_ready(view_forward(x, o2, min_bytes_per_dma=1 << 10))
    ref2 = x.reshape(-1, o2)
    assert out2.shape == ref2.shape, out2.shape
    assert jnp.array_equal(out2, ref2), "Pallas View output mismatch (o=32)"

    # bf16: the DMA path is dtype-agnostic (no sublane-packing concerns).
    xb = x.astype(jnp.bfloat16)
    out3 = jax.block_until_ready(view_forward(xb, o))
    ref3 = xb.reshape(-1, o)
    assert out3.shape == ref3.shape and out3.dtype == jnp.bfloat16
    assert jnp.array_equal(out3, ref3), "Pallas View output mismatch (bf16)"

    print("KERNEL_OK")
</pallas_src>

<mosaic_0001>
module attributes {stable_mosaic.version = 11 : i64} {
  func.func @kernel(%arg0: memref<2x1024xf32, #tpu.memory_space<any>>, %arg1: memref<2x1024xf32, #tpu.memory_space<any>>, %arg2: memref<1x!tpu.dma_semaphore, #tpu.memory_space<semaphore_mem>>) attributes {dimension_semantics = [], scalar_prefetch = 0 : i64, scratch_operands = 1 : i64, tpu.core_type = #tpu.core_type<tc>} {
    %c0_i32 = arith.constant 0 : i32
    %0 = tpu.memref_slice %arg2[%c0_i32] : memref<1x!tpu.dma_semaphore, #tpu.memory_space<semaphore_mem>> -> memref<1x!tpu.dma_semaphore, #tpu.memory_space<semaphore_mem>>
    %1 = tpu.memref_squeeze %0 : memref<1x!tpu.dma_semaphore, #tpu.memory_space<semaphore_mem>> -> memref<!tpu.dma_semaphore, #tpu.memory_space<semaphore_mem>>
    tpu.enqueue_dma source(%arg0 : memref<2x1024xf32, #tpu.memory_space<any>>) target(%arg1 : memref<2x1024xf32, #tpu.memory_space<any>>) target_semaphore(%1 : memref<!tpu.dma_semaphore, #tpu.memory_space<semaphore_mem>>)
    %c0_i32_0 = arith.constant 0 : i32
    %2 = tpu.memref_slice %arg2[%c0_i32_0] : memref<1x!tpu.dma_semaphore, #tpu.memory_space<semaphore_mem>> -> memref<1x!tpu.dma_semaphore, #tpu.memory_space<semaphore_mem>>
    %3 = tpu.memref_squeeze %2 : memref<1x!tpu.dma_semaphore, #tpu.memory_space<semaphore_mem>> -> memref<!tpu.dma_semaphore, #tpu.memory_space<semaphore_mem>>
    tpu.wait_dma2 semaphore(%3 : memref<!tpu.dma_semaphore, #tpu.memory_space<semaphore_mem>>) src(%arg0 : memref<2x1024xf32, #tpu.memory_space<any>>) dst(%arg1 : memref<2x1024xf32, #tpu.memory_space<any>>)
    return
  }
}

</mosaic_0001>

<bundles_post_ra>
// kernel: tpu_custom_call.1
= control target key start
LH: loop header
LB: loop body
LE: loop exit
PB: predicated region body
PF: predicated region fallthrough
CT: control target
= control target key end

     0   :  { %s33_s12 = smov [#allocation2]   ;;  %s34_s13 = smov [#allocation3]   ;;  %s52_s0 = inlined_call_operand.hbm [shape: f32[2,1024], index: 0, kind: input, shape index: {}]   ;;  %s53_s1 = inlined_call_operand.hbm [shape: f32[2,1024], index: 1, kind: output, shape index: {}]  }
   0x1   :  { %s10_s8 = sshll.u32 %s52_s0, 4  ;;  %s12_s11 = sshll.u32 %s53_s1, 4  ;;  %s11_s8 = int_to_ptr.hbm [resolvable:$true] %s10_s8  ;;  %s13_s11 = int_to_ptr.hbm [resolvable:$true] %s12_s11 }
   0x2   :  { %s35_s14 = smov 0  }
   0x3   :  { %16 = dma.general %s11_s8, 256, %s13_s11, %s33_s12, %s34_s13, [#allocation4], %s35_s14, 0  }
   0x4   :  { %31 = dma.done.wait [#allocation2], 256 }
   0x5   :  { %32 = vsyncadd [#allocation2], 4294967040 }
   0x6   :  { %21 = vsyncmov [#allocation2] }
   0x9   :  { %s22_s15 = vpop.sfrf %21 }
   0xa   :  { %p27_p0 = scmp.ne.s32.totalorder %s22_s15, 0 }
   0xc   :  { %26 = shalt.err (%p27_p0)  }

</bundles_post_ra>
